<compile_context>
chip_gen: v5e
topology: v5e:2x2
jax: 0.10.0
libtpu: 0.0.40
codegen_flags: <defaults>
</compile_context>

<pallas_src>
import jax
import jax.numpy as jnp
from jax.experimental import pallas as pl
from jax.experimental.pallas import tpu as pltpu

EPS = 1e-5


# ----------------------------------------------------------------------------- kernel
def baseline_net_kernel(
    x_ref,            # (TILE_N, 392)   f32  (cast to bf16 in-kernel for the MXU)
    w1_ref, b1_ref,   # (392, 256) bf16, (1, 256) f32   [fc1 + bn1, even|odd halves]
    w2_ref, b2_ref,   # (128, 256) bf16, (1, 256) f32   [fc2 + bn2, even|odd halves]
    w3_ref, b3_ref,   # (128, 2)   bf16, (1, 2)   f32
    out_ref,          # (TILE_N, 2)     f32
):
    x = x_ref[...].astype(jnp.bfloat16)

    # fc1 (+folded bn1); output cols laid out as [even(80)|pad(48)|odd(80)|pad(48)]
    h1 = jnp.dot(x, w1_ref[...], preferred_element_type=jnp.float32) + b1_ref[...]
    # relu fused into the pool: max_pool1d(k=2,s=2) == max of the two 128-lane halves,
    # clamped at 0 (padded lanes have zero bias, so they stay exactly 0).
    p1 = jnp.maximum(jnp.maximum(h1[:, :128], h1[:, 128:]), 0.0)

    # fc2 (+folded bn2); padded input rows of w2 are zero
    h2 = jnp.dot(p1.astype(jnp.bfloat16), w2_ref[...],
                 preferred_element_type=jnp.float32) + b2_ref[...]
    p2 = jnp.maximum(jnp.maximum(h2[:, :128], h2[:, 128:]), 0.0)

    # fc3 -> relu
    h3 = jnp.dot(p2.astype(jnp.bfloat16), w3_ref[...],
                 preferred_element_type=jnp.float32) + b3_ref[...]
    out_ref[...] = jnp.maximum(h3, 0.0)


# ------------------------------------------------------------------- host-side folding
def _fold_bn(bn):
    scale = bn["gamma"] / jnp.sqrt(bn["var"] + EPS)
    shift = bn["beta"] - bn["mean"] * scale
    return scale, shift


def _fold_params(params):
    """Fold BN into weights/bias and reorder even/odd pool pairs into lane-aligned halves."""
    s1, t1 = _fold_bn(params["bn1"])          # (160,)
    s2, t2 = _fold_bn(params["bn2"])          # (128,)

    # layer 1: x(392) -> 160, pooled to 80.  Columns: [even 0:80 | 0 | odd 128:208 | 0]
    w1t = params["w1"].T * s1[None, :]        # (392, 160)
    b1f = params["b1"] * s1 + t1              # (160,)
    w1 = jnp.zeros((392, 256), jnp.float32)
    w1 = w1.at[:, 0:80].set(w1t[:, 0::2]).at[:, 128:208].set(w1t[:, 1::2])
    b1 = jnp.zeros((256,), jnp.float32)
    b1 = b1.at[0:80].set(b1f[0::2]).at[128:208].set(b1f[1::2])

    # layer 2: p1(80, padded to 128) -> 128, pooled to 64.
    w2t = params["w2"].T * s2[None, :]        # (80, 128)
    b2f = params["b2"] * s2 + t2              # (128,)
    w2 = jnp.zeros((128, 256), jnp.float32)
    w2 = w2.at[0:80, 0:64].set(w2t[:, 0::2]).at[0:80, 128:192].set(w2t[:, 1::2])
    b2 = jnp.zeros((256,), jnp.float32)
    b2 = b2.at[0:64].set(b2f[0::2]).at[128:192].set(b2f[1::2])

    # layer 3: p2(64, padded to 128) -> 2
    w3 = jnp.zeros((128, 2), jnp.float32).at[0:64, :].set(params["w3"].T)
    b3 = params["b3"]

    # The pool-as-lane-max trick requires padded bias lanes == 0 and padded weight
    # rows == 0 (checked only when values are concrete; skipped under tracing).
    try:
        b1c, b2c, w2c, w3c = (jax.device_get(a) for a in (b1, b2, w2, w3))
        assert not b1c[80:128].any() and not b1c[208:].any()
        assert not b2c[64:128].any() and not b2c[192:].any()
        assert not w2c[80:, :].any()
        assert not w3c[64:, :].any()
    except Exception:
        pass

    return w1, b1, w2, b2, w3, b3


def _round_up(n, m):
    return ((n + m - 1) // m) * m


def _choose_tile_n(n, max_tile_n):
    """Batch tile: multiple of 8 (f32 sublanes), >=2 grid steps when there is enough
    work (v7x megacore), capped at max_tile_n (VMEM bound)."""
    if n <= 8:
        return n                                  # block == full batch dim (always legal)
    if n > max_tile_n:
        return max_tile_n                         # large batch: big tiles amortize per-step overhead
    t = _round_up(n, 8)
    if t >= 512:                                  # enough rows: give each TensorCore a tile
        t = _round_up((t + 1) // 2, 8)
    return t


# --------------------------------------------------------------------------- wrapper
def baseline_net_forward(x, params, *, max_tile_n=2048):
    """Fused BaselineNet forward.  max_tile_n should be a multiple of 256; sweep
    2048-4096 on v6e/v7x, 1024-2048 on v5e."""
    n = x.shape[0]
    x2d = x.reshape(n, -1).astype(jnp.float32)    # x.view(N, -1); no padded copy
    assert x2d.shape[1] == 392, "BaselineNet expects 392 flattened features"
    assert max_tile_n % 8 == 0

    w1, b1, w2, b2, w3, b3 = _fold_params(params)
    w1b, w2b, w3b = (w.astype(jnp.bfloat16) for w in (w1, w2, w3))
    b1r, b2r, b3r = b1.reshape(1, -1), b2.reshape(1, -1), b3.reshape(1, -1)

    tile_n = _choose_tile_n(n, max_tile_n)
    grid = (pl.cdiv(n, tile_n),)                  # last block may be partial; Pallas masks it

    flops = 2 * n * (392 * 256 + 128 * 256 + 128 * 2)
    bytes_accessed = (
        n * 392 * 4                               # x (f32, read once from HBM)
        + (392 * 256 + 128 * 256 + 128 * 2) * 2   # folded weights (bf16, read once; resident)
        + (256 + 256 + 2) * 4                     # biases (f32, read once)
        + n * 2 * 4                               # out (f32)
    )

    out = pl.pallas_call(
        baseline_net_kernel,
        out_shape=jax.ShapeDtypeStruct((n, 2), jnp.float32),
        grid=grid,
        in_specs=[
            pl.BlockSpec((tile_n, 392), lambda i: (i, 0)),   # x tile (pipelined)
            pl.BlockSpec((392, 256), lambda i: (0, 0)),      # w1 (resident)
            pl.BlockSpec((1, 256), lambda i: (0, 0)),        # b1
            pl.BlockSpec((128, 256), lambda i: (0, 0)),      # w2
            pl.BlockSpec((1, 256), lambda i: (0, 0)),        # b2
            pl.BlockSpec((128, 2), lambda i: (0, 0)),        # w3
            pl.BlockSpec((1, 2), lambda i: (0, 0)),          # b3
        ],
        out_specs=pl.BlockSpec((tile_n, 2), lambda i: (i, 0)),
        compiler_params=pltpu.CompilerParams(
            dimension_semantics=("parallel",),               # shard batch across TCs (v7x)
            vmem_limit_bytes=48 * 1024 * 1024),              # explicit, fits v7x's 64 MiB
        cost_estimate=pl.CostEstimate(
            flops=int(flops), transcendentals=0, bytes_accessed=int(bytes_accessed)),
    )(x2d, w1b, b1r, w2b, b2r, w3b, b3r)

    return out


# -------------------------------------------------------------------- params / reference
def _linear_params(key, in_f, out_f):
    """PyTorch nn.Linear default init: U(-1/sqrt(in), 1/sqrt(in))."""
    kw, kb = jax.random.split(key)
    bound = 1.0 / (in_f ** 0.5)
    w = jax.random.uniform(kw, (out_f, in_f), jnp.float32, -bound, bound)
    b = jax.random.uniform(kb, (out_f,), jnp.float32, -bound, bound)
    return w, b


def init_params(key):
    k1, k2, k3 = jax.random.split(key, 3)
    w1, b1 = _linear_params(k1, 392, 160)
    w2, b2 = _linear_params(k2, 80, 128)
    w3, b3 = _linear_params(k3, 64, 2)
    # BatchNorm1d defaults: gamma=1, beta=0, running_mean=0, running_var=1 (eval mode)
    bn1 = dict(gamma=jnp.ones(160), beta=jnp.zeros(160),
               mean=jnp.zeros(160), var=jnp.ones(160))
    bn2 = dict(gamma=jnp.ones(128), beta=jnp.zeros(128),
               mean=jnp.zeros(128), var=jnp.ones(128))
    return dict(w1=w1, b1=b1, w2=w2, b2=b2, w3=w3, b3=b3, bn1=bn1, bn2=bn2)


def baseline_net_reference(x, params):
    """Pure-JAX f32 reference (eval-mode BN, identity dropout)."""
    n = x.shape[0]
    h = x.reshape(n, -1).astype(jnp.float32)
    hp = jax.lax.Precision.HIGHEST

    def bn(h, p):
        return (h - p["mean"]) / jnp.sqrt(p["var"] + EPS) * p["gamma"] + p["beta"]

    h = jax.nn.relu(bn(jnp.dot(h, params["w1"].T, precision=hp) + params["b1"], params["bn1"]))
    h = jnp.max(h.reshape(n, 80, 2), axis=-1)
    h = jax.nn.relu(bn(jnp.dot(h, params["w2"].T, precision=hp) + params["b2"], params["bn2"]))
    h = jnp.max(h.reshape(n, 64, 2), axis=-1)
    h = jax.nn.relu(jnp.dot(h, params["w3"].T, precision=hp) + params["b3"])
    return h


if __name__ == "__main__":
    key = jax.random.PRNGKey(0)
    k_params, k_x = jax.random.split(key)
    params = init_params(k_params)

    # Input consistent with fc1(392): (N, 2, 14, 14) NCHW -> view(N, 392).
    # n=8    : single exact tile (grid=1)
    # n=300  : partial last block (masked rows)
    # n=1024 : two exact 512-row tiles -> exercises megacore batch split
    for n in (8, 300, 1024):
        x = jax.random.normal(jax.random.fold_in(k_x, n), (n, 2, 14, 14), jnp.float32)
        out = jax.block_until_ready(baseline_net_forward(x, params))
        ref = baseline_net_reference(x, params)
        assert out.shape == (n, 2)
        # bf16 matmul inputs with f32 accumulation vs. f32 reference: loose-ish tolerance.
        assert jnp.allclose(out, ref, rtol=5e-2, atol=5e-2), f"mismatch vs JAX reference (n={n})"

    print("KERNEL_OK")
</pallas_src>

<mosaic_0001>
module attributes {stable_mosaic.version = 11 : i64} {
  func.func @baseline_net_kernel(%arg0: i32, %arg1: memref<8x392xf32, #tpu.memory_space<vmem>>, %arg2: memref<392x256xbf16, #tpu.memory_space<vmem>>, %arg3: memref<1x256xf32, #tpu.memory_space<vmem>>, %arg4: memref<128x256xbf16, #tpu.memory_space<vmem>>, %arg5: memref<1x256xf32, #tpu.memory_space<vmem>>, %arg6: memref<128x2xbf16, #tpu.memory_space<vmem>>, %arg7: memref<1x2xf32, #tpu.memory_space<vmem>>, %arg8: memref<8x2xf32, #tpu.memory_space<vmem>>) attributes {dimension_semantics = [#tpu.dimension_semantics<parallel>], iteration_bounds = array<i64: 1>, scalar_prefetch = 0 : i64, scratch_operands = 0 : i64, tpu.core_type = #tpu.core_type<tc>, window_params = [{transform_indices = @transform_0, window_bounds = array<i64: 8, 392>}, {pipeline_mode = #tpu.pipeline_mode<synchronous>, transform_indices = @transform_1, window_bounds = array<i64: 392, 256>}, {pipeline_mode = #tpu.pipeline_mode<synchronous>, transform_indices = @transform_2, window_bounds = array<i64: 1, 256>}, {pipeline_mode = #tpu.pipeline_mode<synchronous>, transform_indices = @transform_3, window_bounds = array<i64: 128, 256>}, {pipeline_mode = #tpu.pipeline_mode<synchronous>, transform_indices = @transform_4, window_bounds = array<i64: 1, 256>}, {pipeline_mode = #tpu.pipeline_mode<synchronous>, transform_indices = @transform_5, window_bounds = array<i64: 128, 2>}, {pipeline_mode = #tpu.pipeline_mode<synchronous>, transform_indices = @transform_6, window_bounds = array<i64: 1, 2>}, {transform_indices = @transform_7, window_bounds = array<i64: 8, 2>}]} {
    %c0 = arith.constant 0 : index
    %c0_0 = arith.constant 0 : index
    %0 = vector.load %arg1[%c0, %c0_0] : memref<8x392xf32, #tpu.memory_space<vmem>>, vector<8x392xf32>
    %1 = arith.truncf %0 : vector<8x392xf32> to vector<8x392xbf16>
    %c0_1 = arith.constant 0 : index
    %c0_2 = arith.constant 0 : index
    %2 = vector.load %arg2[%c0_1, %c0_2] : memref<392x256xbf16, #tpu.memory_space<vmem>>, vector<392x256xbf16>
    %cst = arith.constant dense<0.000000e+00> : vector<8x256xf32>
    %3 = tpu.matmul %1, %2, %cst {dimension_numbers = #tpu.dot_dimension_numbers<[1], [0], [0], [1], [0, 0, 1, 1], [], []>} : vector<8x392xbf16>, vector<392x256xbf16>, vector<8x256xf32> -> vector<8x256xf32>
    %c0_3 = arith.constant 0 : index
    %c0_4 = arith.constant 0 : index
    %4 = vector.load %arg3[%c0_3, %c0_4] : memref<1x256xf32, #tpu.memory_space<vmem>>, vector<1x256xf32>
    %5 = vector.broadcast %4 : vector<1x256xf32> to vector<8x256xf32>
    %6 = arith.addf %3, %5 : vector<8x256xf32>
    %7 = vector.extract_strided_slice %6 {offsets = [0, 0], sizes = [8, 128], strides = [1, 1]} : vector<8x256xf32> to vector<8x128xf32>
    %8 = vector.extract_strided_slice %6 {offsets = [0, 128], sizes = [8, 128], strides = [1, 1]} : vector<8x256xf32> to vector<8x128xf32>
    %9 = arith.maximumf %7, %8 : vector<8x128xf32>
    %cst_5 = arith.constant 0.000000e+00 : f32
    %10 = vector.broadcast %cst_5 : f32 to vector<8x128xf32>
    %11 = arith.maximumf %9, %10 : vector<8x128xf32>
    %12 = arith.truncf %11 : vector<8x128xf32> to vector<8x128xbf16>
    %c0_6 = arith.constant 0 : index
    %c0_7 = arith.constant 0 : index
    %13 = vector.load %arg4[%c0_6, %c0_7] : memref<128x256xbf16, #tpu.memory_space<vmem>>, vector<128x256xbf16>
    %cst_8 = arith.constant dense<0.000000e+00> : vector<8x256xf32>
    %14 = tpu.matmul %12, %13, %cst_8 {dimension_numbers = #tpu.dot_dimension_numbers<[1], [0], [0], [1], [0, 0, 1, 1], [], []>} : vector<8x128xbf16>, vector<128x256xbf16>, vector<8x256xf32> -> vector<8x256xf32>
    %c0_9 = arith.constant 0 : index
    %c0_10 = arith.constant 0 : index
    %15 = vector.load %arg5[%c0_9, %c0_10] : memref<1x256xf32, #tpu.memory_space<vmem>>, vector<1x256xf32>
    %16 = vector.broadcast %15 : vector<1x256xf32> to vector<8x256xf32>
    %17 = arith.addf %14, %16 : vector<8x256xf32>
    %18 = vector.extract_strided_slice %17 {offsets = [0, 0], sizes = [8, 128], strides = [1, 1]} : vector<8x256xf32> to vector<8x128xf32>
    %19 = vector.extract_strided_slice %17 {offsets = [0, 128], sizes = [8, 128], strides = [1, 1]} : vector<8x256xf32> to vector<8x128xf32>
    %20 = arith.maximumf %18, %19 : vector<8x128xf32>
    %cst_11 = arith.constant 0.000000e+00 : f32
    %21 = vector.broadcast %cst_11 : f32 to vector<8x128xf32>
    %22 = arith.maximumf %20, %21 : vector<8x128xf32>
    %23 = arith.truncf %22 : vector<8x128xf32> to vector<8x128xbf16>
    %c0_12 = arith.constant 0 : index
    %c0_13 = arith.constant 0 : index
    %24 = vector.load %arg6[%c0_12, %c0_13] : memref<128x2xbf16, #tpu.memory_space<vmem>>, vector<128x2xbf16>
    %cst_14 = arith.constant dense<0.000000e+00> : vector<8x2xf32>
    %25 = tpu.matmul %23, %24, %cst_14 {dimension_numbers = #tpu.dot_dimension_numbers<[1], [0], [0], [1], [0, 0, 1, 1], [], []>} : vector<8x128xbf16>, vector<128x2xbf16>, vector<8x2xf32> -> vector<8x2xf32>
    %c0_15 = arith.constant 0 : index
    %c0_16 = arith.constant 0 : index
    %26 = vector.load %arg7[%c0_15, %c0_16] : memref<1x2xf32, #tpu.memory_space<vmem>>, vector<1x2xf32>
    %27 = vector.broadcast %26 : vector<1x2xf32> to vector<8x2xf32>
    %28 = arith.addf %25, %27 : vector<8x2xf32>
    %cst_17 = arith.constant 0.000000e+00 : f32
    %29 = vector.broadcast %cst_17 : f32 to vector<8x2xf32>
    %30 = arith.maximumf %28, %29 : vector<8x2xf32>
    %c0_18 = arith.constant 0 : index
    %c0_19 = arith.constant 0 : index
    %31 = vector.load %arg8[%c0_18, %c0_19] : memref<8x2xf32, #tpu.memory_space<vmem>>, vector<8x2xf32>
    tpu.vector_store %arg8[%c0_18, %c0_19], %30 {strides = array<i32>} : memref<8x2xf32, #tpu.memory_space<vmem>>, vector<8x2xf32>,
    return
  }
  func.func @transform_0(%arg0: i32) -> (i32, i32) {
    %c0_i32 = arith.constant 0 : i32
    %c0_i32_0 = arith.constant 0 : i32
    return %arg0, %c0_i32 : i32, i32
  }
  func.func @transform_1(%arg0: i32) -> (i32, i32) {
    %c0_i32 = arith.constant 0 : i32
    %c0_i32_0 = arith.constant 0 : i32
    %c0_i32_1 = arith.constant 0 : i32
    return %c0_i32, %c0_i32_0 : i32, i32
  }
  func.func @transform_2(%arg0: i32) -> (i32, i32) {
    %c0_i32 = arith.constant 0 : i32
    %c0_i32_0 = arith.constant 0 : i32
    %c0_i32_1 = arith.constant 0 : i32
    return %c0_i32, %c0_i32_0 : i32, i32
  }
  func.func @transform_3(%arg0: i32) -> (i32, i32) {
    %c0_i32 = arith.constant 0 : i32
    %c0_i32_0 = arith.constant 0 : i32
    %c0_i32_1 = arith.constant 0 : i32
    return %c0_i32, %c0_i32_0 : i32, i32
  }
  func.func @transform_4(%arg0: i32) -> (i32, i32) {
    %c0_i32 = arith.constant 0 : i32
    %c0_i32_0 = arith.constant 0 : i32
    %c0_i32_1 = arith.constant 0 : i32
    return %c0_i32, %c0_i32_0 : i32, i32
  }
  func.func @transform_5(%arg0: i32) -> (i32, i32) {
    %c0_i32 = arith.constant 0 : i32
    %c0_i32_0 = arith.constant 0 : i32
    %c0_i32_1 = arith.constant 0 : i32
    return %c0_i32, %c0_i32_0 : i32, i32
  }
  func.func @transform_6(%arg0: i32) -> (i32, i32) {
    %c0_i32 = arith.constant 0 : i32
    %c0_i32_0 = arith.constant 0 : i32
    %c0_i32_1 = arith.constant 0 : i32
    return %c0_i32, %c0_i32_0 : i32, i32
  }
  func.func @transform_7(%arg0: i32) -> (i32, i32) {
    %c0_i32 = arith.constant 0 : i32
    %c0_i32_0 = arith.constant 0 : i32
    return %arg0, %c0_i32 : i32, i32
  }
}

</mosaic_0001>

<bundles_post_ra>
// kernel: tpu_custom_call.1
= control target key start
LH: loop header
LB: loop body
LE: loop exit
PB: predicated region body
PF: predicated region fallthrough
CT: control target
= control target key end

     0   :  { %12 = vsyncpa [#allocation3], 0  ;;  %s1246_s0 = inlined_call_operand.vmem [shape: f32[8,392], index: 0, kind: input, shape index: {}]   ;;  %s1247_s1 = inlined_call_operand.hbm [shape: bf16[392,256], index: 1, kind: input, shape index: {}]   ;;  %s1248_s2 = inlined_call_operand.vmem [shape: f32[1,256], index: 2, kind: input, shape index: {}]   ;;  %s1249_s3 = inlined_call_operand.hbm [shape: bf16[128,256], index: 3, kind: input, shape index: {}]   ;;  %s1250_s4 = inlined_call_operand.vmem [shape: f32[1,256], index: 4, kind: input, shape index: {}]   ;;  %s1251_s5 = inlined_call_operand.vmem [shape: bf16[128,2], index: 5, kind: input, shape index: {}]   ;;  %s1252_s6 = inlined_call_operand.vmem [shape: f32[1,2], index: 6, kind: input, shape index: {}]   ;;  %s1253_s7 = inlined_call_operand.vmem [shape: f32[8,2], index: 7, kind: output, shape index: {}]  }
   0x1   :  { %s20_s26 = sshll.u32 %s1247_s1, 4  ;;  %s21_s26 = int_to_ptr.hbm [resolvable:$true] %s20_s26 }
   0x2   :  { %13 = vsyncpa [#allocation5], 0  ;;  %s1125_s27 = smov [#allocation2]   ;;  %s35_s8 = sshll.u32 %s1249_s3, 4  ;;  %s36_s8 = int_to_ptr.hbm [resolvable:$true] %s35_s8 }
   0x3   :  { %s22_s28 = sshll.u32 %s1125_s27, 4  ;;  %s1126_s9 = smov 128   ;;  %s23_s28 = int_to_ptr.vmem [resolvable:$true] %s22_s28 }
   0x4   :  { %s1127_s10 = smov 8   ;;  %s1128_s11 = smov [#allocation4]  }
   0x5   :  { %28 = dma.hbm_to_vmem [thread:$0]  %s21_s26, 6272, %s23_s28, [#allocation3], %s1126_s9, %s1126_s9, %s1127_s10  }
   0x6   :  { %s37_s12 = sshll.u32 %s1128_s11, 4  ;;  %s38_s12 = int_to_ptr.vmem [resolvable:$true] %s37_s12 }
   0x7   :  { %43 = dma.hbm_to_vmem [thread:$0]  %s36_s8, 2048, %s38_s12, [#allocation5], %s1126_s9, %s1126_s9, %s1127_s10  }
   0x8   :  { %1121 = dma.done.wait [#allocation3], 6272  }
   0x9   :  { %1122 = vsyncadd [#allocation3], 4294961024 }
   0xa   :  { %1123 = dma.done.wait [#allocation5], 2048  }
   0xb   :  { %1124 = vsyncadd [#allocation5], 4294965248  ;;  %v764_v0 = vld [vmem:[#allocation2 + $0x70] sm:$0xf]  ;;  %v1011_v1 = vld [vmem:[#allocation2 + $0x74] sm:$0xf0] }
   0xc   :  { %v828_v2 = vld [vmem:[#allocation2 + $0xf0] sm:$0xf]  ;;  %v765_v3 = vor.u32 %v1011_v1, %v764_v0  ;;  %v1027_v4 = vld [vmem:[#allocation2 + $0xf4] sm:$0xf0]  ;;  %v756_v9 = vld [vmem:[#allocation2 + $0x60] sm:$0xf] }
   0xd   :  { %v892_v5 = vld [vmem:[#allocation2 + $0x170] sm:$0xf]  ;;  %v1043_v6 = vld [vmem:[#allocation2 + $0x174] sm:$0xf0]  ;;  %v829_v7 = vor.u32 %v1027_v4, %v828_v2  ;;  %v1009_v10 = vld [vmem:[#allocation2 + $0x64] sm:$0xf0] }
   0xe   :  { %v893_v8 = vor.u32 %v1043_v6, %v892_v5  ;;  %v820_v11 = vld [vmem:[#allocation2 + $0xe0] sm:$0xf]  ;;  %378 = vmatpush.bf16.msra.mxu0 %v765_v3  ;;  %v757_v12 = vor.u32 %v1009_v10, %v756_v9  ;;  %v1025_v13 = vld [vmem:[#allocation2 + $0xe4] sm:$0xf0]  ;;  %v748_v18 = vld [vmem:[#allocation2 + $0x50] sm:$0xf] }
   0xf   :  { %v884_v14 = vld [vmem:[#allocation2 + $0x160] sm:$0xf]  ;;  %v1041_v15 = vld [vmem:[#allocation2 + $0x164] sm:$0xf0]  ;;  %391 = vmatpush.bf16.msra.mxu1 %v829_v7  ;;  %v821_v16 = vor.u32 %v1025_v13, %v820_v11  ;;  %v1007_v19 = vld [vmem:[#allocation2 + $0x54] sm:$0xf0] }
  0x10   :  { %404 = vmatpush.bf16.msra.mxu2 %v893_v8  ;;  %v885_v17 = vor.u32 %v1041_v15, %v884_v14  ;;  %v812_v20 = vld [vmem:[#allocation2 + $0xd0] sm:$0xf]  ;;  %v1023_v21 = vld [vmem:[#allocation2 + $0xd4] sm:$0xf0]  ;;  %v749_v24 = vor.u32 %v1007_v19, %v748_v18  ;;  %v740_v25 = vld [vmem:[#allocation2 + $0x40] sm:$0xf] }
  0x11   :  { %v876_v22 = vld [vmem:[#allocation2 + $0x150] sm:$0xf]  ;;  %v1039_v23 = vld [vmem:[#allocation2 + $0x154] sm:$0xf0]  ;;  %v1175_v26 = vld [vmem:[#allocation2 + $0x180] sm:$0xff]  ;;  %vm371_vm0 = vcmask 1043456   ;;  %v813_v28 = vor.u32 %v1023_v21, %v812_v20 }
  0x12   :  { %379 = vmatpush.bf16.msra.mxu0 %v757_v12  ;;  %v1010_v27 = vld [vmem:[#allocation2 + $0x74] sm:$0xf]  ;;  %v877_v29 = vor.u32 %v1039_v23, %v876_v22  ;;  %v1005_v30 = vld [vmem:[#allocation2 + $0x44] sm:$0xf0]  ;;  %v804_v31 = vld [vmem:[#allocation2 + $0xc0] sm:$0xf]  ;;  %v267_v32 = vunpack.c.l.b16 %v1175_v26  ;;  %v268_v23 = vunpack.c.h.b16 %v1175_v26 }
  0x13   :  { %392 = vmatpush.bf16.msra.mxu1 %v821_v16  ;;  %v766_v33 = vld [vmem:[#allocation2 + $0x78] sm:$0xf0]  ;;  %v1021_v34 = vld [vmem:[#allocation2 + $0xc4] sm:$0xf0]  ;;  %v868_v35 = vld [vmem:[#allocation2 + $0x140] sm:$0xf]  ;;  %v741_v39 = vor.u32 %v1005_v30, %v740_v25 }
  0x14   :  { %405 = vmatpush.bf16.msra.mxu2 %v885_v17  ;;  %v1037_v36 = vld [vmem:[#allocation2 + $0x144] sm:$0xf0]  ;;  %v317_v37 = vpack.c.b16 %v267_v32, %v267_v32  ;;  %v769_v38 = vor.u32 %v1010_v27, %v766_v33  ;;  %v732_v40 = vld [vmem:[#allocation2 + $0x30] sm:$0xf]  ;;  %v1008_v41 = vld [vmem:[#allocation2 + $0x64] sm:$0xf]  ;;  %v805_v43 = vor.u32 %v1021_v34, %v804_v31 }
  0x15   :  { %v758_v42 = vld [vmem:[#allocation2 + $0x68] sm:$0xf0]  ;;  %v869_v45 = vor.u32 %v1037_v36, %v868_v35  ;;  %v1003_v46 = vld [vmem:[#allocation2 + $0x34] sm:$0xf0]  ;;  %v796_v47 = vld [vmem:[#allocation2 + $0xb0] sm:$0xf] }
  0x16   :  { %380 = vmatpush.bf16.msra.mxu0 %v749_v24  ;;  %v373_v44 = vsel %vm371_vm0, %v317_v37, 0  ;;  %v62_v48 = vld [vmem:[%s1246_s0 + $0x18] sm:$0xff]  ;;  %v860_v50 = vld [vmem:[#allocation2 + $0x130] sm:$0xf]  ;;  %v761_v53 = vor.u32 %v1008_v41, %v758_v42  ;;  %vm367_vm1 = vcmask 64512   ;;  %v733_v54 = vor.u32 %v1003_v46, %v732_v40  ;;  %v59_v35 = vld [vmem:[%s1246_s0] sm:$0xff] }
  0x17   :  { %393 = vmatpush.bf16.msra.mxu1 %v813_v28  ;;  %424 = vmatpush.bf16.msra.mxu3 %v373_v44  ;;  %v1019_v49 = vld [vmem:[#allocation2 + $0xb4] sm:$0xf0]  ;;  %v1182_v52 = vpack.c.bf16 %v62_v48, %v62_v48  ;;  %v1006_v55 = vld [vmem:[#allocation2 + $0x54] sm:$0xf]  ;;  %v750_v56 = vld [vmem:[#allocation2 + $0x58] sm:$0xf0] }
  0x18   :  { %406 = vmatpush.bf16.msra.mxu2 %v877_v29  ;;  %v1035_v51 = vld [vmem:[#allocation2 + $0x134] sm:$0xf0]  ;;  %v797_v57 = vor.u32 %v1019_v49, %v796_v47  ;;  %v724_v59 = vld [vmem:[#allocation2 + $0x20] sm:$0xf]  ;;  %v1001_v60 = vld [vmem:[#allocation2 + $0x24] sm:$0xf0]  ;;  %v753_v1 = vor.u32 %v1006_v55, %v750_v56  ;;  %v63_v47 = vpack.c.bf16 %v59_v35, %v59_v35 }
  0x19   :  { %v861_v58 = vor.u32 %v1035_v51, %v860_v50  ;;  %v788_v61 = vld [vmem:[#allocation2 + $0xa0] sm:$0xf]  ;;  %v1017_v62 = vld [vmem:[#allocation2 + $0xa4] sm:$0xf0]  ;;  %v725_v2 = vor.u32 %v1001_v60, %v724_v59  ;;  %v1004_v3 = vld [vmem:[#allocation2 + $0x44] sm:$0xf] }
  0x1a   :  { %381 = vmatpush.bf16.msra.mxu0 %v741_v39  ;;  %v852_v63 = vld [vmem:[#allocation2 + $0x120] sm:$0xf]  ;;  %v1033_v0 = vld [vmem:[#allocation2 + $0x124] sm:$0xf0]  ;;  %898 = vmatmul.msk.bf16.vlgmr.msra.gmra.mxu3 %vm367_vm1, %v1182_v52  ;;  %v742_v4 = vld [vmem:[#allocation2 + $0x48] sm:$0xf0]  ;;  %v789_v5 = vor.u32 %v1017_v62, %v788_v61 }
  0x1b   :  { %430 = vmatpush.bf16.msrb.mxu3 %v769_v38  ;;  %394 = vmatpush.bf16.msra.mxu1 %v805_v43  ;;  %v853_v6 = vor.u32 %v1033_v0, %v852_v63  ;;  %v716_v7 = vld [vmem:[#allocation2 + $0x10] sm:$0xf]  ;;  %v999_v8 = vld [vmem:[#allocation2 + $0x14] sm:$0xf0]  ;;  %v745_v13 = vor.u32 %v1004_v3, %v742_v4  ;;  %v708_v15 = vld [vmem:[#allocation2] sm:$0xf]  ;;  %v318_v38 = vpack.c.b16 %v268_v23, %v268_v23 }
  0x1c   :  { %407 = vmatpush.bf16.msra.mxu2 %v869_v45  ;;  %v780_v9 = vld [vmem:[#allocation2 + $0x90] sm:$0xf]  ;;  %v1015_v10 = vld [vmem:[#allocation2 + $0x94] sm:$0xf0]  ;;  %v717_v14 = vor.u32 %v999_v8, %v716_v7  ;;  %v1002_v16 = vld [vmem:[#allocation2 + $0x34] sm:$0xf] }
  0x1d   :  { %v844_v11 = vld [vmem:[#allocation2 + $0x110] sm:$0xf]  ;;  %v1031_v12 = vld [vmem:[#allocation2 + $0x114] sm:$0xf0]  ;;  %v734_v17 = vld [vmem:[#allocation2 + $0x38] sm:$0xf0]  ;;  %v781_v18 = vor.u32 %v1015_v10, %v780_v9 }
  0x1e   :  { %382 = vmatpush.bf16.msra.mxu0 %v733_v54  ;;  %v845_v19 = vor.u32 %v1031_v12, %v844_v11  ;;  %v997_v20 = vld [vmem:[#allocation2 + $0x4] sm:$0xf0]  ;;  %v772_v21 = vld [vmem:[#allocation2 + $0x80] sm:$0xf]  ;;  %v1026_v24 = vld [vmem:[#allocation2 + $0xf4] sm:$0xf]  ;;  %v737_v28 = vor.u32 %v1002_v16, %v734_v17 }
  0x1f   :  { %431 = vmatpush.bf16.msrb.mxu3 %v761_v53  ;;  %395 = vmatpush.bf16.msra.mxu1 %v797_v57  ;;  %v1013_v22 = vld [vmem:[#allocation2 + $0x84] sm:$0xf0]  ;;  %v830_v25 = vld [vmem:[#allocation2 + $0xf8] sm:$0xf0]  ;;  %v1042_v27 = vld [vmem:[#allocation2 + $0x174] sm:$0xf]  ;;  %v709_v32 = vor.u32 %v997_v20, %v708_v15 }
  0x20   :  { %408 = vmatpush.bf16.msra.mxu2 %v861_v58  ;;  %v894_v29 = vld [vmem:[#allocation2 + $0x178] sm:$0xf0]  ;;  %v836_v30 = vld [vmem:[#allocation2 + $0x100] sm:$0xf]  ;;  %v1029_v31 = vld [vmem:[#allocation2 + $0x104] sm:$0xf0]  ;;  %v773_v36 = vor.u32 %v1013_v22, %v772_v21  ;;  %v833_v26 = vor.u32 %v1026_v24, %v830_v25 }
  0x21   :  { %v1000_v33 = vld [vmem:[#allocation2 + $0x24] sm:$0xf]  ;;  %v726_v34 = vld [vmem:[#allocation2 + $0x28] sm:$0xf0]  ;;  %v897_v39 = vor.u32 %v1042_v27, %v894_v29  ;;  %v837_v40 = vor.u32 %v1029_v31, %v836_v30  ;;  %v61_v43 = vld [vmem:[%s1246_s0 + $0x10] sm:$0xff]  ;;  %v376_v54 = vsel %vm371_vm0, %v318_v38, 0 }
  0x22   :  { %383 = vmatpush.bf16.msra.mxu0 %v725_v2  ;;  %v60_v37 = vld [vmem:[%s1246_s0 + $0x8] sm:$0xff]  ;;  %v1024_v41 = vld [vmem:[#allocation2 + $0xe4] sm:$0xf]  ;;  %v729_v44 = vor.u32 %v1000_v33, %v726_v34  ;;  %v998_v48 = vld [vmem:[#allocation2 + $0x14] sm:$0xf]  ;;  %v1198_v53 = vpack.c.bf16 %v61_v43, %v61_v43  ;;  %vm698_vm2 = vcmask 15360  }
  0x23   :  { %432 = vmatpush.bf16.msrb.mxu3 %v753_v1  ;;  %396 = vmatpush.bf16.msra.mxu1 %v789_v5  ;;  %v822_v42 = vld [vmem:[#allocation2 + $0xe8] sm:$0xf0]  ;;  %v1040_v45 = vld [vmem:[#allocation2 + $0x164] sm:$0xf]  ;;  %v718_v49 = vld [vmem:[#allocation2 + $0x18] sm:$0xf0]  ;;  %v1196_v50 = vpack.c.bf16 %v60_v37, %v60_v37 }
  0x24   :  { %409 = vmatpush.bf16.msra.mxu2 %v853_v6  ;;  %v886_v46 = vld [vmem:[#allocation2 + $0x168] sm:$0xf0]  ;;  %v825_v51 = vor.u32 %v1024_v41, %v822_v42  ;;  %v1022_v56 = vld [vmem:[#allocation2 + $0xd4] sm:$0xf]  ;;  %v814_v57 = vld [vmem:[#allocation2 + $0xd8] sm:$0xf0]  ;;  %v721_v58 = vor.u32 %v998_v48, %v718_v49 }
  0x25   :  { %v889_v55 = vor.u32 %v1040_v45, %v886_v46  ;;  %v1038_v59 = vld [vmem:[#allocation2 + $0x154] sm:$0xf]  ;;  %v878_v60 = vld [vmem:[#allocation2 + $0x158] sm:$0xf0]  ;;  %v996_v61 = vld [vmem:[#allocation2 + $0x4] sm:$0xf]  ;;  %v817_v63 = vor.u32 %v1022_v56, %v814_v57 }
  0x26   :  { %384 = vmatpush.bf16.msra.mxu0 %v717_v14  ;;  %v710_v62 = vld [vmem:[#allocation2 + $0x8] sm:$0xf0]  ;;  %v881_v0 = vor.u32 %v1038_v59, %v878_v60  ;;  %v1020_v1 = vld [vmem:[#allocation2 + $0xc4] sm:$0xf]  ;;  %v1018_v8 = vld [vmem:[#allocation2 + $0xb4] sm:$0xf] }
  0x27   :  { %433 = vmatpush.bf16.msrb.mxu3 %v745_v13  ;;  %397 = vmatpush.bf16.msra.mxu1 %v781_v18  ;;  %v806_v2 = vld [vmem:[#allocation2 + $0xc8] sm:$0xf0]  ;;  %v713_v3 = vor.u32 %v996_v61, %v710_v62  ;;  %v1036_v4 = vld [vmem:[#allocation2 + $0x144] sm:$0xf]  ;;  %v798_v9 = vld [vmem:[#allocation2 + $0xb8] sm:$0xf0] }
  0x28   :  { %410 = vmatpush.bf16.msra.mxu2 %v845_v19  ;;  %v870_v5 = vld [vmem:[#allocation2 + $0x148] sm:$0xf0]  ;;  %v809_v6 = vor.u32 %v1020_v1, %v806_v2  ;;  %v1034_v10 = vld [vmem:[#allocation2 + $0x134] sm:$0xf]  ;;  %v862_v11 = vld [vmem:[#allocation2 + $0x138] sm:$0xf0]  ;;  %v801_v12 = vor.u32 %v1018_v8, %v798_v9 }
  0x29   :  { %v873_v7 = vor.u32 %v1036_v4, %v870_v5  ;;  %v865_v13 = vor.u32 %v1034_v10, %v862_v11  ;;  %v1016_v14 = vld [vmem:[#allocation2 + $0xa4] sm:$0xf]  ;;  %v790_v15 = vld [vmem:[#allocation2 + $0xa8] sm:$0xf0]  ;;  %v1014_v20 = vld [vmem:[#allocation2 + $0x94] sm:$0xf] }
  0x2a   :  { %385 = vmatpush.bf16.msra.mxu0 %v709_v32  ;;  %v1032_v16 = vld [vmem:[#allocation2 + $0x124] sm:$0xf]  ;;  %v854_v17 = vld [vmem:[#allocation2 + $0x128] sm:$0xf0]  ;;  %v793_v18 = vor.u32 %v1016_v14, %v790_v15  ;;  %v782_v21 = vld [vmem:[#allocation2 + $0x98] sm:$0xf0] }
  0x2b   :  { %434 = vmatpush.bf16.msrb.mxu3 %v737_v28  ;;  %398 = vmatpush.bf16.msra.mxu1 %v773_v36  ;;  %v857_v19 = vor.u32 %v1032_v16, %v854_v17  ;;  %v1030_v22 = vld [vmem:[#allocation2 + $0x114] sm:$0xf]  ;;  %v846_v23 = vld [vmem:[#allocation2 + $0x118] sm:$0xf0]  ;;  %v785_v24 = vor.u32 %v1014_v20, %v782_v21  ;;  %v1012_v27 = vld [vmem:[#allocation2 + $0x84] sm:$0xf] }
  0x2c   :  { %411 = vmatpush.bf16.msra.mxu2 %v837_v40  ;;  %v849_v25 = vor.u32 %v1030_v22, %v846_v23  ;;  %v774_v28 = vld [vmem:[#allocation2 + $0x88] sm:$0xf0]  ;;  %v1028_v29 = vld [vmem:[#allocation2 + $0x104] sm:$0xf]  ;;  %v958_v33 = vld [vmem:[#allocation4 + $0x70] sm:$0xf] }
  0x2d   :  { %386 = vmatmul.bf16.vlgmr.msra.gmra.mxu0 %v63_v47  ;;  %v838_v30 = vld [vmem:[#allocation2 + $0x108] sm:$0xf0]  ;;  %v777_v31 = vor.u32 %v1012_v27, %v774_v28  ;;  %v1059_v34 = vld [vmem:[#allocation4 + $0x74] sm:$0xf0]  ;;  %v960_v36 = vld [vmem:[#allocation4 + $0x78] sm:$0xf0] }
  0x2e   :  { %443 = vmatpush.bf16.msrb.mxu0 %v833_v26  ;;  %399 = vmatmul.bf16.vlgmr.msra.gmra.mxu1 %v1196_v50  ;;  %v841_v32 = vor.u32 %v1028_v29, %v838_v30  ;;  %v959_v35 = vor.u32 %v1059_v34, %v958_v33  ;;  %v950_v37 = vld [vmem:[#allocation4 + $0x60] sm:$0xf]  ;;  %v1057_v38 = vld [vmem:[#allocation4 + $0x64] sm:$0xf0]  ;;  %v952_v41 = vld [vmem:[#allocation4 + $0x68] sm:$0xf0] }
  0x2f   :  { %456 = vmatpush.bf16.msrb.mxu1 %v897_v39  ;;  %435 = vmatpush.bf16.msrb.mxu3 %v729_v44  ;;  %v1056_v39 = vld [vmem:[#allocation4 + $0x64] sm:$0xf]  ;;  %v951_v40 = vor.u32 %v1057_v38, %v950_v37  ;;  %v942_v43 = vld [vmem:[#allocation4 + $0x50] sm:$0xf]  ;;  %v1055_v44 = vld [vmem:[#allocation4 + $0x54] sm:$0xf0] }
  0x30   :  { %476 = vmatpush.bf16.msrb.mxu2 %v376_v54  ;;  %v955_v42 = vor.u32 %v1056_v39, %v952_v41  ;;  %v1054_v45 = vld [vmem:[#allocation4 + $0x54] sm:$0xf]  ;;  %v943_v46 = vor.u32 %v1055_v44, %v942_v43  ;;  %v934_v48 = vld [vmem:[#allocation4 + $0x40] sm:$0xf]  ;;  %v1053_v49 = vld [vmem:[#allocation4 + $0x44] sm:$0xf0] }
  0x31   :  { %412 = vmatmul.bf16.vlgmr.msra.gmra.mxu2 %v1198_v53  ;;  %v935_v54 = vor.u32 %v1053_v49, %v934_v48  ;;  %v926_v57 = vld [vmem:[#allocation4 + $0x30] sm:$0xf]  ;;  %v1050_v59 = vld [vmem:[#allocation4 + $0x34] sm:$0xf]  ;;  %v928_v61 = vld [vmem:[#allocation4 + $0x38] sm:$0xf0] }
  0x32   :  { %444 = vmatpush.bf16.msrb.mxu0 %v825_v51  ;;  %v1052_v51 = vld [vmem:[#allocation4 + $0x44] sm:$0xf]  ;;  %v931_v62 = vor.u32 %v1050_v59, %v928_v61  ;;  %v1049_v1 = vld [vmem:[#allocation4 + $0x24] sm:$0xf0]  ;;  %v920_v4 = vld [vmem:[#allocation4 + $0x28] sm:$0xf0] }
  0x33   :  { %457 = vmatpush.bf16.msrb.mxu1 %v889_v55  ;;  %436 = vmatpush.bf16.msrb.mxu3 %v721_v58  ;;  %v1051_v58 = vld [vmem:[#allocation4 + $0x34] sm:$0xf0]  ;;  %v1048_v2 = vld [vmem:[#allocation4 + $0x24] sm:$0xf]  ;;  %v910_v8 = vld [vmem:[#allocation4 + $0x10] sm:$0xf] }
  0x34   :  { %v927_v60 = vor.u32 %v1051_v58, %v926_v57  ;;  %v923_v5 = vor.u32 %v1048_v2, %v920_v4  ;;  %v1047_v9 = vld [vmem:[#allocation4 + $0x14] sm:$0xf0]  ;;  %v1046_v10 = vld [vmem:[#allocation4 + $0x14] sm:$0xf]  ;;  %v902_v14 = vld [vmem:[#allocation4] sm:$0xf] }
  0x35   :  { %v911_v11 = vor.u32 %v1047_v9, %v910_v8  ;;  %v1045_v15 = vld [vmem:[#allocation4 + $0x4] sm:$0xf0]  ;;  %v1044_v16 = vld [vmem:[#allocation4 + $0x4] sm:$0xf]  ;;  %v1067_v23 = vld [vmem:[%s1251_s5 + $0x38] sm:$0xff] }
  0x36   :  { %445 = vmatpush.bf16.msrb.mxu0 %v817_v63  ;;  %v903_v17 = vor.u32 %v1045_v15, %v902_v14  ;;  %v1065_v28 = vld [vmem:[%s1251_s5 + $0x28] sm:$0xff]  ;;  %v1062_v37 = vld [vmem:[%s1251_s5 + $0x10] sm:$0xff]  ;;  %v1072_v2 = vld [vmem:[%s1252_s6] ss:$0 sm:$0xff] }
  0x37   :  { %458 = vmatpush.bf16.msrb.mxu1 %v881_v0  ;;  %437 = vmatpush.bf16.msrb.mxu3 %v713_v3  ;;  %v918_v0 = vld [vmem:[#allocation4 + $0x20] sm:$0xf] }
  0x38   :  { %v919_v3 = vor.u32 %v1049_v1, %v918_v0 }
  0x3a   :  { %446 = vmatpush.bf16.msrb.mxu0 %v809_v6  ;;  %438 = vmatmul.bf16.vlgmr.msrb.gmra.mxu3 %v63_v47  ;;  %v944_v47 = vld [vmem:[#allocation4 + $0x58] sm:$0xf0] }
  0x3b   :  { %459 = vmatpush.bf16.msrb.mxu1 %v873_v7  ;;  %587 = vmatpush.bf16.msra.mxu3 %v959_v35 }
  0x3e   :  { %447 = vmatpush.bf16.msrb.mxu0 %v801_v12  ;;  %v912_v12 = vld [vmem:[#allocation4 + $0x18] sm:$0xf0] }
  0x3f   :  { %460 = vmatpush.bf16.msrb.mxu1 %v865_v13  ;;  %588 = vmatpush.bf16.msra.mxu3 %v951_v40  ;;  %v915_v13 = vor.u32 %v1046_v10, %v912_v12 }
  0x41   :  { %899 = vmatmul.msk.bf16.vlgmr.msrb.gmra.mxu2 %vm367_vm1, %v1182_v52  ;;  %v1058_v52 = vld [vmem:[#allocation4 + $0x74] sm:$0xf] }
  0x42   :  { %448 = vmatpush.bf16.msrb.mxu0 %v793_v18  ;;  %v963_v26 = vor.u32 %v1058_v52, %v960_v36  ;;  %v904_v18 = vld [vmem:[#allocation4 + $0x8] sm:$0xf0]  ;;  %v1063_v52 = vld [vmem:[%s1251_s5 + $0x18] sm:$0xff] }
  0x43   :  { %461 = vmatpush.bf16.msrb.mxu1 %v857_v19  ;;  %589 = vmatpush.bf16.msra.mxu3 %v943_v46  ;;  %v907_v19 = vor.u32 %v1044_v16, %v904_v18 }
  0x44   :  { %600 = vmatpush.bf16.msra.mxu2 %v963_v26 }
  0x46   :  { %449 = vmatpush.bf16.msrb.mxu0 %v785_v24  ;;  %v1066_v24 = vld [vmem:[%s1251_s5 + $0x30] sm:$0xff] }
  0x47   :  { %462 = vmatpush.bf16.msrb.mxu1 %v849_v25  ;;  %590 = vmatpush.bf16.msra.mxu3 %v935_v54  ;;  %v116_v25 = vld [vmem:[%s1248_s2] sm:$0x3] }
  0x48   :  { %601 = vmatpush.bf16.msra.mxu2 %v955_v42  ;;  %v118_v30 = vperm.slane %v116_v25, 0  ;;  %v119_v33 = vperm.slane %v116_v25, 1  ;;  %v501_v54 = vld [vmem:[%s1250_s4] sm:$0x3] }
  0x4a   :  { %450 = vmatpush.bf16.msrb.mxu0 %v777_v31  ;;  %v1064_v31 = vld [vmem:[%s1251_s5 + $0x20] sm:$0xff] }
  0x4b   :  { %463 = vmatpush.bf16.msrb.mxu1 %v841_v32  ;;  %591 = vmatpush.bf16.msra.mxu3 %v927_v60 }
  0x4d   :  { %451 = vmatmul.bf16.vlgmr.msrb.gmra.mxu0 %v1196_v50  ;;  %v947_v50 = vor.u32 %v1054_v45, %v944_v47 }
  0x4e   :  { %464 = vmatmul.bf16.vlgmr.msrb.gmra.mxu1 %v1198_v53  ;;  %v936_v53 = vld [vmem:[#allocation4 + $0x48] sm:$0xf0]  ;;  %684 = vmatpush.bf16.msra.mxu0 %v1067_v23 }
  0x4f   :  { %602 = vmatpush.bf16.msra.mxu2 %v947_v50  ;;  %v939_v56 = vor.u32 %v1052_v51, %v936_v53  ;;  %592 = vmatpush.bf16.msra.mxu3 %v919_v3  ;;  %v1061_v51 = vld [vmem:[%s1251_s5 + $0x8] sm:$0xff]  ;;  %v1060_v53 = vld [vmem:[%s1251_s5] sm:$0xff] }
  0x52   :  { %685 = vmatpush.bf16.msra.mxu0 %v1066_v24 }
  0x53   :  { %603 = vmatpush.bf16.msra.mxu2 %v939_v56  ;;  %593 = vmatpush.bf16.msra.mxu3 %v911_v11  ;;  %v504_v56 = vperm.slane %v501_v54, 1 }
  0x56   :  { %686 = vmatpush.bf16.msra.mxu0 %v1065_v28 }
  0x57   :  { %604 = vmatpush.bf16.msra.mxu2 %v931_v62  ;;  %594 = vmatpush.bf16.msra.mxu3 %v903_v17 }
  0x5a   :  { %687 = vmatpush.bf16.msra.mxu0 %v1064_v31 }
  0x5b   :  { %605 = vmatpush.bf16.msra.mxu2 %v923_v5 }
  0x5e   :  { %688 = vmatpush.bf16.msra.mxu0 %v1063_v52 }
  0x5f   :  { %606 = vmatpush.bf16.msra.mxu2 %v915_v13 }
  0x62   :  { %689 = vmatpush.bf16.msra.mxu0 %v1062_v37 }
  0x63   :  { %607 = vmatpush.bf16.msra.mxu2 %v907_v19 }
  0x66   :  { %690 = vmatpush.bf16.msra.mxu0 %v1061_v51 }
  0x6a   :  { %691 = vmatpush.bf16.msra.mxu0 %v1060_v53 }
  0x9d   :  { %v1207_v55 = vpop.f32.mrf.mxu3 }
  0xa5   :  { %v428_v63 = vpop.f32.mrf.mxu3 }
  0xaa   :  { %v387_v6 = vpop.f32.mrf.mxu0 }
  0xab   :  { %v400_v7 = vpop.f32.mrf.mxu1  ;;  %v388_v32 = vadd.f32 %v387_v6, %v118_v30 }
  0xad   :  { %v401_v36 = vadd.f32 %v400_v7, %v388_v32 }
  0xb2   :  { %v389_v21 = vpop.f32.mrf.mxu0 }
  0xb3   :  { %v402_v22 = vpop.f32.mrf.mxu1 }
  0xb4   :  { %v413_v20 = vpop.f32.mrf.mxu2 }
  0xb5   :  { %v414_v39 = vadd.f32 %v413_v20, %v401_v36 }
  0xb7   :  { %v427_v44 = vadd.f32 %v1207_v55, %v414_v39  ;;  %v503_v55 = vperm.slane %v501_v54, 0 }
  0xbc   :  { %v415_v27 = vpop.f32.mrf.mxu2 }
  0xbd   :  { %v439_v29 = vpop.f32.mrf.mxu3 }
  0xbe   :  { %v440_v26 = vadd.f32 %v439_v29, %v119_v33 }
  0xc4   :  { %v478_v34 = vpop.f32.mrf.mxu2 }
  0xc5   :  { %v441_v35 = vpop.f32.mrf.mxu3 }
  0xca   :  { %v452_v38 = vpop.f32.mrf.mxu0 }
  0xcb   :  { %v453_v40 = vadd.f32 %v452_v38, %v440_v26  ;;  %v465_v41 = vpop.f32.mrf.mxu1 }
  0xcc   :  { %v480_v43 = vpop.f32.mrf.mxu2 }
  0xcd   :  { %v466_v42 = vadd.f32 %v465_v41, %v453_v40 }
  0xcf   :  { %v479_v45 = vadd.f32 %v478_v34, %v466_v42 }
  0xd1   :  { %v482_v46 = vmax.f32 %v427_v44, %v479_v45 }
  0xd2   :  { %v454_v47 = vpop.f32.mrf.mxu0 }
  0xd3   :  { %v483_v48 = vmax.f32 %v482_v46, 0.0  ;;  %v467_v49 = vpop.f32.mrf.mxu1 }
  0xd5   :  { %v484_v50 = vpack.c.bf16 %v483_v48, %v483_v48 }
  0xd7   :  { %595 = vmatmul.bf16.vlgmr.msra.gmra.mxu3 %v484_v50  ;;  %608 = vmatmul.bf16.vlgmr.msra.gmra.mxu2 %v484_v50 }
 0x15a   :  { %v596_v57 = vpop.f32.mrf.mxu3  ;;  %v609_v58 = vpop.f32.mrf.mxu2 }
 0x15b   :  { %v597_v59 = vadd.f32 %v596_v57, %v503_v55  ;;  %v610_v60 = vadd.f32 %v609_v58, %v504_v56 }
 0x15d   :  { %v613_v61 = vmax.f32 %v597_v59, %v610_v60 }
 0x15f   :  { %v614_v62 = vmax.f32 %v613_v61, 0.0 }
 0x161   :  { %v615_v63 = vpack.c.bf16 %v614_v62, %v614_v62 }
 0x162   :  { %v598_v0 = vpop.f32.mrf.mxu3  ;;  %v611_v1 = vpop.f32.mrf.mxu2 }
 0x163   :  { %692 = vmatmul.bf16.vlgmr.msra.gmra.mxu0 %v615_v63 }
 0x1e0   :  { %v693_v3 = vpop.f32.mrf.mxu0 }
 0x1e1   :  { %v694_v4 = vadd.f32 %v1072_v2, %v693_v3 }
 0x1e3   :  { %v697_v5 = vmax.f32 %v694_v4, 0.0 }
 0x1e5   :  { %699 = vst.msk [vmem:[%s1253_s7] sm:$0xff] %vm698_vm2, %v697_v5 }
 0x1e8   :  { %v695_v6 = vpop.f32.mrf.mxu0 }
 0x1e9   :  { %704 = vsyncpa [#allocation3], 1 }
 0x1ea   :  { %705 = vsyncpa [#allocation5], 1 }

</bundles_post_ra>
